<compile_context>
chip_gen: v5e
topology: v5e:2x2
jax: 0.10.0
libtpu: 0.0.40
codegen_flags: <defaults>
</compile_context>

<pallas_src>
import math

import jax
import jax.numpy as jnp
from jax.experimental import pallas as pl
from jax.experimental.pallas import tpu as pltpu

_HALO = 8  # sublane-aligned vertical halo (>= pad); keeps scratch stores on vreg row boundaries


def _gaussian_taps_1d(kernel_size: int, sigma: float):
    """Normalized 1D taps; outer(t, t) equals the module's normalized 2D kernel."""
    taps = [math.exp(-(i - kernel_size // 2) ** 2 / (2.0 * sigma ** 2))
            for i in range(kernel_size)]
    s = sum(taps)
    return [t / s for t in taps]


def get_gaussian_kernel_2d(kernel_size: int, sigma: float) -> jnp.ndarray:
    t = jnp.array(_gaussian_taps_1d(kernel_size, sigma), dtype=jnp.float32)
    return jnp.outer(t, t)  # identical to GaussianModel.get_gaussian_kernel (per channel)


def _banded_toeplitz(width: int, taps) -> jnp.ndarray:
    """(W, W) matrix B with B[i, j] = taps[i - j + pad] for |i - j| <= pad, else 0.

    Right-multiplying a row-major image slab by B applies the horizontal 1D tap
    filter with 'same' zero padding, so the lane-direction convolution runs on the
    MXU and no lane padding / lane-shifted loads / masked edge stores are needed.
    """
    pad = (len(taps) - 1) // 2
    t = jnp.array(taps, dtype=jnp.float32)
    idx = jnp.arange(width)
    d = idx[:, None] - idx[None, :]
    vals = t[jnp.clip(d + pad, 0, len(taps) - 1)]
    return jnp.where(jnp.abs(d) <= pad, vals, 0.0).astype(jnp.float32)


def _physical_vmem_bytes() -> int:
    """Per-core VMEM capacity; conservative fallback = 64 MiB (v7x)."""
    try:
        cap = getattr(pltpu.get_tpu_info(), "vmem_capacity_bytes", None)
        if cap:
            return int(cap)
    except Exception:
        pass
    return 64 << 20


def _strips(H: int):
    """Row strips for the fused vertical+horizontal passes (multiples of 8 rows)."""
    if H <= 256:
        return [(0, H)]
    sh = 64
    return [(h0, min(sh, H - h0)) for h0 in range(0, H, sh)]


def _footprint_bytes(cb: int, H: int, W: int, strip_h: int) -> int:
    """Per-step VMEM footprint estimate (double-buffered blocks + scratch + temps)."""
    blocks = 6 * cb * H * W * 4                 # 1 in + 2 out blocks, 2-deep buffered
    scratch = cb * (H + 2 * _HALO) * W * 4      # padded scratch (single buffer)
    live = cb * H * W * 4 + 2 * cb * strip_h * W * 4   # loaded x value + strip temps
    band = 2 * W * W * 4                        # banded Toeplitz (double-buffered input)
    return blocks + scratch + live + band


def _pick_channel_block(N: int, C: int, H: int, W: int, strip_h: int,
                        budget_bytes: int, min_steps: int = 8) -> int:
    """Largest channel divisor that fits the VMEM budget while keeping the grid
    big enough (>= min_steps) for megacore sharding and pipeline overlap."""
    fitting = [d for d in range(1, C + 1)
               if C % d == 0 and _footprint_bytes(d, H, W, strip_h) <= budget_bytes]
    if not fitting:
        # TODO(synk): H tiling with a 2*pad halo for planes beyond the VMEM budget.
        return 1
    keeps_grid = [d for d in fitting if N * (C // d) >= min_steps]
    return max(keeps_grid) if keeps_grid else min(fitting)


def make_gaussian_model(img_channels: int, kernel_size: int, sigma: float):
    """Returns a callable x -> (gaussian_img, edge_img), x in NCHW float32."""
    assert kernel_size % 2 == 1, \
        "kernel_size must be odd to match PyTorch padding=(kernel_size-1)//2"
    pad = (kernel_size - 1) // 2
    assert pad <= _HALO, "kernel_size must be <= 17 (vertical halo is 8 sublanes)"
    K = kernel_size
    taps = _gaussian_taps_1d(kernel_size, sigma)  # Python floats, baked into the trace

    def forward(x: jnp.ndarray):
        assert x.ndim == 4 and x.shape[1] == img_channels, "expected NCHW input"
        x = x.astype(jnp.float32)
        N, C, H, W = x.shape

        strips = _strips(H)
        strip_h = max(hs for _, hs in strips)

        phys = _physical_vmem_bytes()
        budget = min(phys // 2, 96 << 20)
        Cb = _pick_channel_block(N, C, H, W, strip_h, budget)

        fp = _footprint_bytes(Cb, H, W, strip_h)
        vmem_limit = int(min(phys - (8 << 20), max(2 * fp + (8 << 20), 32 << 20)))
        vmem_limit = max(vmem_limit, 16 << 20)

        band = _banded_toeplitz(W, taps)          # (W, W) constant, stays resident in VMEM
        Hs_scr = H + 2 * _HALO                    # scratch rows (sublane-aligned halo)

        def kernel_body(x_ref, b_ref, g_ref, e_ref, xpad):
            # x_ref/g_ref/e_ref: (Cb, H, W) f32 VMEM; b_ref: (W, W); xpad: (Cb, H+16, W).
            cb = x_ref.shape[0]

            # 1) Halo-only zeroing (top + bottom _HALO rows), aligned full-width stores.
            zhalo = jnp.zeros((cb, _HALO, W), jnp.float32)
            xpad[:, 0:_HALO, :] = zhalo
            xpad[:, _HALO + H:_HALO + H + _HALO, :] = zhalo

            # 2) Interior store at sublane offset 8: unmasked, lane-dense, aligned.
            xv = x_ref[...]
            xpad[:, _HALO:_HALO + H, :] = xv

            bmat = b_ref[...]

            # 3) Strip-fused separable Gaussian (keeps the intermediate small).
            for h0, hs in strips:
                base = _HALO - pad + h0
                # Vertical 1D pass: K sublane-shifted reads + VPU MACs.
                acc = taps[0] * xpad[:, base:base + hs, :]
                for dy in range(1, K):
                    acc = acc + taps[dy] * xpad[:, base + dy:base + dy + hs, :]
                # Horizontal 1D pass on the MXU: banded Toeplitz matmul encodes the
                # 'same' zero padding, so no lane shifts and no masked stores.
                y = jnp.dot(acc.reshape(cb * hs, W), bmat,
                            preferred_element_type=jnp.float32).reshape(cb, hs, W)
                g_ref[:, h0:h0 + hs, :] = y
                e_ref[:, h0:h0 + hs, :] = xv[:, h0:h0 + hs, :] - y  # fused residual

        blk = (None, Cb, H, W)                   # batch dim squeezed -> 3D refs
        idx = lambda n, c: (n, c, 0, 0)
        bidx = lambda n, c: (0, 0)               # constant block -> fetched once, kept resident

        gaussian_img, edge_img = pl.pallas_call(
            kernel_body,
            out_shape=(
                jax.ShapeDtypeStruct((N, C, H, W), jnp.float32),
                jax.ShapeDtypeStruct((N, C, H, W), jnp.float32),
            ),
            grid_spec=pltpu.PrefetchScalarGridSpec(
                num_scalar_prefetch=0,
                grid=(N, C // Cb),
                in_specs=[pl.BlockSpec(blk, idx),
                          pl.BlockSpec((W, W), bidx)],
                out_specs=[pl.BlockSpec(blk, idx), pl.BlockSpec(blk, idx)],
                scratch_shapes=[pltpu.VMEM((Cb, Hs_scr, W), jnp.float32)],
            ),
            compiler_params=pltpu.CompilerParams(
                dimension_semantics=("parallel", "parallel"),
                vmem_limit_bytes=vmem_limit,
            ),
        )(x, band)
        return gaussian_img, edge_img

    return forward


def _reference_forward(x, weight_2d, img_channels, pad):
    """Pure-JAX depthwise-conv reference for the correctness check."""
    K = weight_2d.shape[0]
    w = jnp.broadcast_to(weight_2d, (img_channels, 1, K, K))
    g = jax.lax.conv_general_dilated(
        x, w,
        window_strides=(1, 1),
        padding=((pad, pad), (pad, pad)),
        dimension_numbers=("NCHW", "OIHW", "NCHW"),
        feature_group_count=img_channels,
        precision=jax.lax.Precision.HIGHEST,
    )
    return g, x - g


if __name__ == "__main__":
    # small shapes consistent with the module's forward
    N, C, H, W = 2, 4, 16, 16
    kernel_size, sigma = 5, 1.0

    key = jax.random.PRNGKey(0)
    x = jax.random.normal(key, (N, C, H, W), dtype=jnp.float32)

    model = make_gaussian_model(img_channels=C, kernel_size=kernel_size, sigma=sigma)
    gaussian_img, edge_img = model(x)
    jax.block_until_ready((gaussian_img, edge_img))

    # sanity check against a pure-JAX depthwise conv reference
    pad = (kernel_size - 1) // 2
    w2d = get_gaussian_kernel_2d(kernel_size, sigma)
    g_ref, e_ref = _reference_forward(x, w2d, C, pad)
    assert jnp.allclose(gaussian_img, g_ref, atol=1e-3, rtol=1e-3)
    assert jnp.allclose(edge_img, e_ref, atol=1e-3, rtol=1e-3)

    print("KERNEL_OK")
</pallas_src>

<mosaic_0001>
module attributes {stable_mosaic.version = 11 : i64} {
  func.func @kernel_body(%arg0: i32, %arg1: i32, %arg2: memref<1x1x16x16xf32, #tpu.memory_space<vmem>>, %arg3: memref<16x16xf32, #tpu.memory_space<vmem>>, %arg4: memref<1x1x16x16xf32, #tpu.memory_space<vmem>>, %arg5: memref<1x1x16x16xf32, #tpu.memory_space<vmem>>, %arg6: memref<1x32x16xf32, #tpu.memory_space<vmem>>) attributes {dimension_semantics = [#tpu.dimension_semantics<parallel>, #tpu.dimension_semantics<parallel>], iteration_bounds = array<i64: 2, 4>, scalar_prefetch = 0 : i64, scratch_operands = 1 : i64, tpu.core_type = #tpu.core_type<tc>, window_params = [{transform_indices = @transform_0, window_bounds = array<i64: 1, 1, 16, 16>}, {pipeline_mode = #tpu.pipeline_mode<synchronous>, transform_indices = @transform_1, window_bounds = array<i64: 16, 16>}, {transform_indices = @transform_2, window_bounds = array<i64: 1, 1, 16, 16>}, {transform_indices = @transform_3, window_bounds = array<i64: 1, 1, 16, 16>}]} {
    %cst = arith.constant 0.000000e+00 : f32
    %0 = vector.broadcast %cst : f32 to vector<1x8x16xf32>
    %c0 = arith.constant 0 : index
    %c0_0 = arith.constant 0 : index
    %c0_1 = arith.constant 0 : index
    %1 = vector.load %arg6[%c0, %c0_0, %c0_1] : memref<1x32x16xf32, #tpu.memory_space<vmem>>, vector<1x8x16xf32>
    tpu.vector_store %arg6[%c0, %c0_0, %c0_1], %0 {strides = array<i32>} : memref<1x32x16xf32, #tpu.memory_space<vmem>>, vector<1x8x16xf32>,
    %c0_2 = arith.constant 0 : index
    %c24 = arith.constant 24 : index
    %c0_3 = arith.constant 0 : index
    %2 = vector.load %arg6[%c0_2, %c24, %c0_3] : memref<1x32x16xf32, #tpu.memory_space<vmem>>, vector<1x8x16xf32>
    tpu.vector_store %arg6[%c0_2, %c24, %c0_3], %0 {strides = array<i32>} : memref<1x32x16xf32, #tpu.memory_space<vmem>>, vector<1x8x16xf32>,
    %c0_4 = arith.constant 0 : index
    %c0_5 = arith.constant 0 : index
    %c0_6 = arith.constant 0 : index
    %c0_7 = arith.constant 0 : index
    %3 = vector.load %arg2[%c0_4, %c0_5, %c0_6, %c0_7] : memref<1x1x16x16xf32, #tpu.memory_space<vmem>>, vector<1x1x16x16xf32>
    %4 = vector.shape_cast %3 : vector<1x1x16x16xf32> to vector<1x16x16xf32>
    %c0_8 = arith.constant 0 : index
    %c8 = arith.constant 8 : index
    %c0_9 = arith.constant 0 : index
    %5 = vector.load %arg6[%c0_8, %c8, %c0_9] : memref<1x32x16xf32, #tpu.memory_space<vmem>>, vector<1x16x16xf32>
    tpu.vector_store %arg6[%c0_8, %c8, %c0_9], %4 {strides = array<i32>} : memref<1x32x16xf32, #tpu.memory_space<vmem>>, vector<1x16x16xf32>,
    %c0_10 = arith.constant 0 : index
    %c0_11 = arith.constant 0 : index
    %6 = vector.load %arg3[%c0_10, %c0_11] : memref<16x16xf32, #tpu.memory_space<vmem>>, vector<16x16xf32>
    %c0_12 = arith.constant 0 : index
    %c6 = arith.constant 6 : index
    %c0_13 = arith.constant 0 : index
    %7 = vector.load %arg6[%c0_12, %c6, %c0_13] : memref<1x32x16xf32, #tpu.memory_space<vmem>>, vector<1x16x16xf32>
    %cst_14 = arith.constant 0.054488685 : f32
    %8 = vector.broadcast %cst_14 : f32 to vector<1x16x16xf32>
    %9 = arith.mulf %8, %7 : vector<1x16x16xf32>
    %c0_15 = arith.constant 0 : index
    %c7 = arith.constant 7 : index
    %c0_16 = arith.constant 0 : index
    %10 = vector.load %arg6[%c0_15, %c7, %c0_16] : memref<1x32x16xf32, #tpu.memory_space<vmem>>, vector<1x16x16xf32>
    %cst_17 = arith.constant 0.244201347 : f32
    %11 = vector.broadcast %cst_17 : f32 to vector<1x16x16xf32>
    %12 = arith.mulf %11, %10 : vector<1x16x16xf32>
    %13 = arith.addf %9, %12 : vector<1x16x16xf32>
    %c0_18 = arith.constant 0 : index
    %c8_19 = arith.constant 8 : index
    %c0_20 = arith.constant 0 : index
    %14 = vector.load %arg6[%c0_18, %c8_19, %c0_20] : memref<1x32x16xf32, #tpu.memory_space<vmem>>, vector<1x16x16xf32>
    %cst_21 = arith.constant 0.402619958 : f32
    %15 = vector.broadcast %cst_21 : f32 to vector<1x16x16xf32>
    %16 = arith.mulf %15, %14 : vector<1x16x16xf32>
    %17 = arith.addf %13, %16 : vector<1x16x16xf32>
    %c0_22 = arith.constant 0 : index
    %c9 = arith.constant 9 : index
    %c0_23 = arith.constant 0 : index
    %18 = vector.load %arg6[%c0_22, %c9, %c0_23] : memref<1x32x16xf32, #tpu.memory_space<vmem>>, vector<1x16x16xf32>
    %cst_24 = arith.constant 0.244201347 : f32
    %19 = vector.broadcast %cst_24 : f32 to vector<1x16x16xf32>
    %20 = arith.mulf %19, %18 : vector<1x16x16xf32>
    %21 = arith.addf %17, %20 : vector<1x16x16xf32>
    %c0_25 = arith.constant 0 : index
    %c10 = arith.constant 10 : index
    %c0_26 = arith.constant 0 : index
    %22 = vector.load %arg6[%c0_25, %c10, %c0_26] : memref<1x32x16xf32, #tpu.memory_space<vmem>>, vector<1x16x16xf32>
    %cst_27 = arith.constant 0.054488685 : f32
    %23 = vector.broadcast %cst_27 : f32 to vector<1x16x16xf32>
    %24 = arith.mulf %23, %22 : vector<1x16x16xf32>
    %25 = arith.addf %21, %24 : vector<1x16x16xf32>
    %26 = vector.shape_cast %25 : vector<1x16x16xf32> to vector<16x16xf32>
    %cst_28 = arith.constant dense<0.000000e+00> : vector<16x16xf32>
    %27 = tpu.matmul %26, %6, %cst_28 {dimension_numbers = #tpu.dot_dimension_numbers<[1], [0], [0], [1], [0, 0, 1, 1], [], []>} : vector<16x16xf32>, vector<16x16xf32>, vector<16x16xf32> -> vector<16x16xf32>
    %28 = vector.shape_cast %27 : vector<16x16xf32> to vector<1x16x16xf32>
    %c0_29 = arith.constant 0 : index
    %c0_30 = arith.constant 0 : index
    %c0_31 = arith.constant 0 : index
    %c0_32 = arith.constant 0 : index
    %29 = vector.load %arg4[%c0_29, %c0_30, %c0_31, %c0_32] : memref<1x1x16x16xf32, #tpu.memory_space<vmem>>, vector<1x1x16x16xf32>
    %30 = vector.shape_cast %29 : vector<1x1x16x16xf32> to vector<1x16x16xf32>
    %31 = vector.shape_cast %28 : vector<1x16x16xf32> to vector<1x1x16x16xf32>
    tpu.vector_store %arg4[%c0_29, %c0_30, %c0_31, %c0_32], %31 {strides = array<i32>} : memref<1x1x16x16xf32, #tpu.memory_space<vmem>>, vector<1x1x16x16xf32>,
    %32 = arith.subf %4, %28 : vector<1x16x16xf32>
    %c0_33 = arith.constant 0 : index
    %c0_34 = arith.constant 0 : index
    %c0_35 = arith.constant 0 : index
    %c0_36 = arith.constant 0 : index
    %33 = vector.load %arg5[%c0_33, %c0_34, %c0_35, %c0_36] : memref<1x1x16x16xf32, #tpu.memory_space<vmem>>, vector<1x1x16x16xf32>
    %34 = vector.shape_cast %33 : vector<1x1x16x16xf32> to vector<1x16x16xf32>
    %35 = vector.shape_cast %32 : vector<1x16x16xf32> to vector<1x1x16x16xf32>
    tpu.vector_store %arg5[%c0_33, %c0_34, %c0_35, %c0_36], %35 {strides = array<i32>} : memref<1x1x16x16xf32, #tpu.memory_space<vmem>>, vector<1x1x16x16xf32>,
    return
  }
  func.func @transform_0(%arg0: i32, %arg1: i32) -> (i32, i32, i32, i32) {
    %c0_i32 = arith.constant 0 : i32
    %c0_i32_0 = arith.constant 0 : i32
    %c0_i32_1 = arith.constant 0 : i32
    return %arg0, %arg1, %c0_i32, %c0_i32_0 : i32, i32, i32, i32
  }
  func.func @transform_1(%arg0: i32, %arg1: i32) -> (i32, i32) {
    %c0_i32 = arith.constant 0 : i32
    %c0_i32_0 = arith.constant 0 : i32
    %c0_i32_1 = arith.constant 0 : i32
    return %c0_i32, %c0_i32_0 : i32, i32
  }
  func.func @transform_2(%arg0: i32, %arg1: i32) -> (i32, i32, i32, i32) {
    %c0_i32 = arith.constant 0 : i32
    %c0_i32_0 = arith.constant 0 : i32
    %c0_i32_1 = arith.constant 0 : i32
    return %arg0, %arg1, %c0_i32, %c0_i32_0 : i32, i32, i32, i32
  }
  func.func @transform_3(%arg0: i32, %arg1: i32) -> (i32, i32, i32, i32) {
    %c0_i32 = arith.constant 0 : i32
    %c0_i32_0 = arith.constant 0 : i32
    %c0_i32_1 = arith.constant 0 : i32
    return %arg0, %arg1, %c0_i32, %c0_i32_0 : i32, i32, i32, i32
  }
}

</mosaic_0001>

<bundles_post_ra>
// kernel: tpu_custom_call.1
= control target key start
LH: loop header
LB: loop body
LE: loop exit
PB: predicated region body
PF: predicated region fallthrough
CT: control target
= control target key end

     0   :  { %s1056_s0 = inlined_call_operand.hbm [shape: f32[2,4,16,16], index: 0, kind: input, shape index: {}]   ;;  %s1057_s1 = inlined_call_operand.hbm [shape: f32[16,16], index: 1, kind: input, shape index: {}]   ;;  %s1058_s2 = inlined_call_operand.hbm [shape: f32[2,4,16,16], index: 2, kind: output, shape index: {0}]   ;;  %s1059_s3 = inlined_call_operand.hbm [shape: f32[2,4,16,16], index: 3, kind: output, shape index: {1}]  }
   0x1   :  { %1068 = sst [smem:[#allocation20_spill]] %s1057_s1 }
   0x2   :  { %9 = vsyncpa [#allocation4], 0 }
   0x3   :  { %11 = vsyncpa [#allocation4 + $0x1], 0 }
   0x4   :  { %12 = vsyncpa [#allocation7], 0 }
   0x5   :  { %13 = vsyncpa [#allocation5], 0 }
   0x6   :  { %15 = vsyncpa [#allocation5 + $0x1], 0 }
   0x7   :  { %16 = vsyncpa [#allocation10], 0 }
   0x8   :  { %18 = vsyncpa [#allocation10 + $0x1], 0  ;;  %s838_s12 = smov 0   ;;  %s840_s13 = smov 0  }
   0x9   :  { %s842_s14 = smov 0   ;;  %s844_s15 = smov 0  }
   0xa   :  { %s846_s16 = smov 0   ;;  %s848_s17 = smov 0  }
   0xb   :  { %s850_s18 = smov 0   ;;  %s852_s19 = smov 0  }
   0xc LB: > { %1069 = sst [smem:[#allocation15_spill]] %s782_s12  ;;  %s489_s20 = sadd.s32 4294967295, %s810_s19   ;;  %s810_s19 = sphi %s852_s19, %s24_s19   ;;  %s806_s18 = sphi %s850_s18, %s1094_s18   ;;  %s802_s17 = sphi %s848_s17, %s1093_s17   ;;  %s798_s16 = sphi %s846_s16, %s1092_s16   ;;  %s794_s15 = sphi %s844_s15, %s1091_s15   ;;  %s790_s14 = sphi %s842_s14, %s1090_s14   ;;  %s786_s13 = sphi %s840_s13, %s1089_s13   ;;  %s782_s12 = sphi %s838_s12, %s1088_s12  }
   0xd   : > { %s490_s21 = sadd.s32 4294967294, %s810_s19   ;;  %p58_p0 = scmp.ne.s32.totalorder %s786_s13, %s782_s12 }
   0xe   : > { %p882_p1 = scmp.eq.s32.totalorder %s489_s20, 0  ;;  %p111_p2 = scmp.eq.s32.totalorder %s490_s21, 7 }
   0xf   : > { %p491_p4 = scmp.ge.s32.totalorder %s810_s19, 1  ;;  %p146_p6 = scmp.lt.s32.totalorder %s810_s19, 9 }
  0x10   : > { %p888_p3 = por %p882_p1, %p58_p0  ;;  %p893_p5 = por %p111_p2, %p58_p0 }
  0x11   : > { %s1074_s1 = sld [smem:[#allocation20_spill]]  ;;  %p901_p7 = pnand %p491_p4, %p146_p6 }
  0x12   : > { %s1072_s24 = scalar_select %p893_p5, 1, 0 }
  0x13   : > { %p527_p8 = pneg %p901_p7  ;;  %s812_s29 = smov [#allocation6]  }
  0x14   : > { %1073 = sst [smem:[#allocation16_spill]] %s1072_s24  ;;  %s159_s30 = sshll.u32 %s812_s29, 4  ;;  %s160_s30 = int_to_ptr.vmem [resolvable:$true] %s159_s30 }
  0x15   : > { %p528_p9 = pnand %p527_p8, %p882_p1  ;;  %s1060_s4 = smov 128  }
  0x16   : > { %s1061_s5 = smov 8   ;;  %s33_s6 = sadd.s32 1, %s802_s17 }
  0x17   : > { %s157_s27 = sshll.u32 %s1074_s1, 4  ;;  %p34_p10 = scmp.ge.s32.totalorder %s33_s6, 4  ;;  %s158_s27 = int_to_ptr.hbm [resolvable:$true] %s157_s27 }
  0x18   : > { %530 = dma.hbm_to_vmem [thread:$0]  (!%p528_p9), %s158_s27, 256, %s160_s30, [#allocation7], %s1060_s4, %s1060_s4, %s1061_s5  }
  0x19   : > { %s36_s7 = sadd.s32 1, %s806_s18  ;;  %p105_p11 = scmp.eq.s32.totalorder %s489_s20, 7 }
  0x1a   : > { %p52_p12 = scmp.ne.s32.totalorder %s790_s14, %s786_s13  ;;  %s1096_s6 = smov (%p34_p10, %s33_s6), 0 }
  0x1b   : > { %1076 = sst [smem:[#allocation17_spill]] %s1096_s6  ;;  %s1098_s7 = smov (!%p34_p10, %s36_s7), %s806_s18 }
  0x1c   : > { %s45_s8 = sadd.s32 1, %s790_s14  ;;  %p53_p13 = scmp.eq.s32.totalorder %s810_s19, 0 }
  0x1d   : > { %p38_p0 = scmp.ge.s32.totalorder %s1098_s7, 2  ;;  %p921_p2 = por %p105_p11, %p52_p12 }
  0x1e   : > { %s41_s10 = ssub.s32 %s802_s17, %s1096_s6  ;;  %p927_p4 = por %p53_p13, %p52_p12 }
  0x1f   : > { %s1077_s9 = scalar_select %p921_p2, 1, 0 }
  0x20   : > { %s1100_s7 = smov (%p38_p0, %s1098_s7), 0  ;;  %p543_p6 = scmp.lt.s32.totalorder %s810_s19, 8 }
  0x21   : > { %1078 = sst [smem:[#allocation18_spill]] %s1077_s9  ;;  %s173_s20 = sand.u32 1, %s790_s14  }
  0x22   : > { %1080 = sst [smem:[#allocation19_spill]] %s1100_s7  ;;  %s40_s21 = ssub.s32 %s806_s18, %s1100_s7 }
  0x23   : > { %s495_s25 = sshll.u32 %s802_s17, 1  ;;  %s42_s26 = sor.u32 %s41_s10, %s40_s21 }
  0x24   : > { %s494_s27 = sshll.u32 %s173_s20, 4  ;;  %p43_p8 = scmp.eq.s32.totalorder %s42_s26, 0 }
  0x25   : > { %s496_s29 = sshll.u32 %s806_s18, 3  ;;  %s177_s30 = scalar_lea.vmem [#allocation3], %s494_s27 }
  0x26   : > { %s187_s4 = sshll.u32 %s177_s30, 4  ;;  %s182_s1 = sadd.s32 %s496_s29, %s495_s25  ;;  %s188_s4 = int_to_ptr.vmem [resolvable:$true] %s187_s4 }
  0x27   : > { %s940_s5 = scalar_select %p43_p8, %s790_s14, %s45_s8  }
  0x28   : > { %s497_s6 = sshll.u32 %s182_s1, 3  ;;  %p532_p9 = pnand %p543_p6, %p927_p4 }
  0x29   : > { %s184_s9 = scalar_lea.hbm %s1056_s0, %s497_s6  ;;  %s174_s10 = scalar_lea.sflag [#allocation4], %s173_s20 }
  0x2a   : > { %s185_s7 = sshll.u32 %s184_s9, 4  ;;  %s1081_s21 = smov 8   ;;  %s186_s7 = int_to_ptr.hbm [resolvable:$true] %s185_s7 }
  0x2b   : > { %s1082_s26 = smov 128   ;;  %199 = sbr.rel (%p901_p7) target bundleno = 219 (0xdb), region = 28 }
  0x2c   : > { %534 = dma.hbm_to_vmem [thread:$0]  (!%p532_p9), %s186_s7, 256, %s188_s4, %s174_s10, %s1082_s26, %s1082_s26, %s1081_s21  }
  0x2d   : > { %s955_s1 = sand.u32 (!%p901_p7), 1, %s786_s13  }
  0x2e   : > { %s958_s8 = sshll.u32 (!%p901_p7), %s955_s1, 4  ;;  %s202_s12 = scalar_lea.sflag (!%p901_p7), [#allocation4], %s955_s1 }
  0x2f   : > { %s205_s24 = scalar_lea.vmem (!%p901_p7), [#allocation3], %s958_s8 }
  0x30   : > { %765 = dma.done.wait (%p888_p3), %s202_s12, 256  }
  0x31   : > { %767 = vsyncadd (%p888_p3), %s202_s12, 4294967040 }
  0x32   : > { %769 = dma.done.wait (%p882_p1), [#allocation7], 256  }
  0x33   : > { %771 = vsyncadd (%p882_p1), [#allocation7], 4294967040  ;;  %vm239_vm0 = vcmask 130048   ;;  %v815_v0 = vmov 0.0   ;;  %v247_v1 = vld [vmem:[#allocation6 + $0x8] sm:$0xff]  ;;  %v246_v2 = vld [vmem:[#allocation6] sm:$0xff] }
  0x34   : > { %240 = vst.msk [vmem:[#allocation2] sm:$0xff] %vm239_vm0, %v815_v0  ;;  %v242_v3 = vld [vmem:[%s205_s24] sm:$0xff]  ;;  %296 = vmatpush.msra.mxu0 %v247_v1  ;;  %515 = vmatpush.msra.mxu1 %v247_v1  ;;  %v972_v4 = vld [vmem:[%s205_s24 + $0x8] sm:$0xff]  ;;  %s507_s22 = sshll.u32 %s794_s15, 1  ;;  %s508_s23 = sshll.u32 %s798_s16, 3 }
  0x35   : > { %241 = vst.msk [vmem:[#allocation2 + $0x18] sm:$0xff] %vm239_vm0, %v815_v0  ;;  %s328_s28 = sadd.s32 %s508_s23, %s507_s22  ;;  %s231_s11 = scalar_lea.vmem [#allocation8], %s958_s8 }
  0x36   : > { %244 = vst.msk [vmem:[#allocation2 + $0x8] sm:$0xff] %vm239_vm0, %v242_v3  ;;  %297 = vmatpush.msra.mxu0 %v246_v2  ;;  %516 = vmatpush.msra.mxu1 %v246_v2  ;;  %s509_s4 = sshll.u32 %s328_s28, 3  ;;  %s331_s20 = sshll.u32 %s231_s11, 4  ;;  %s332_s20 = int_to_ptr.vmem [resolvable:$true] %s331_s20 }
  0x37   : > { %245 = vst.msk [vmem:[#allocation2 + $0x10] sm:$0xff] %vm239_vm0, %v972_v4  ;;  %s330_s9 = scalar_lea.hbm %s1058_s2, %s509_s4  ;;  %s349_s29 = scalar_lea.hbm %s1059_s3, %s509_s4 }
  0x38   : > { %s989_s30 = scalar_lea.vmem [#allocation9], %s958_s8  ;;  %s333_s16 = sshll.u32 %s330_s9, 4  ;;  %s334_s16 = int_to_ptr.hbm [resolvable:$true] %s333_s16 }
  0x39   : > { %s350_s15 = sshll.u32 %s989_s30, 4  ;;  %s352_s21 = sshll.u32 %s349_s29, 4  ;;  %s995_s15 = int_to_ptr.vmem [resolvable:$true] %s350_s15  ;;  %s999_s21 = int_to_ptr.hbm [resolvable:$true] %s352_s21 }
  0x3a   : > { %s312_s26 = scalar_lea.sflag [#allocation5], %s955_s1  ;;  %s690_s8 = sshra.s32 %s334_s16, 4  ;;  %s691_s8 = int_to_ptr.hbm [resolvable:$true] %s690_s8 }
  0x3b   : > { %s692_s12 = scalar_lea.hbm %s691_s8, 16  ;;  %s696_s23 = scalar_lea.hbm %s1058_s2, 128 }
  0x3c   : > { %p693_p1 = scmp.ne.s32.totalorder %s691_s8, %s692_s12  ;;  %p697_p10 = scmp.lt.s32.totalorder %s691_s8, %s1058_s2 }
  0x3d   : > { %v248_v5 = vld [vmem:[#allocation2 + $0x6] sm:$0xff]  ;;  %p698_p11 = scmp.lt.s32.totalorder %s696_s23, %s692_s12 }
  0x3e   : > { %v252_v6 = vld [vmem:[#allocation2 + $0x7] sm:$0xff]  ;;  %v250_v8 = vmul.f32 0.054488685, %v248_v5  ;;  %v253_v17 = vld [vmem:[#allocation2 + $0xf] sm:$0xff]  ;;  %p694_p3 = pnand %p693_p1, %p921_p2 }
  0x3f   : > { %v258_v7 = vld [vmem:[#allocation2 + $0x8] sm:$0xff]  ;;  %v254_v9 = vmul.f32 0.24420135, %v252_v6  ;;  %v259_v18 = vld [vmem:[#allocation2 + $0x10] sm:$0xff]  ;;  %v255_v22 = vmul.f32 0.24420135, %v253_v17  ;;  %p699_p12 = por %p698_p11, %p697_p10 }
  0x40   : > { %v260_v10 = vmul.f32 0.40261996, %v258_v7  ;;  %v264_v11 = vld [vmem:[#allocation2 + $0x9] sm:$0xff]  ;;  %v265_v19 = vld [vmem:[#allocation2 + $0x11] sm:$0xff]  ;;  %v261_v23 = vmul.f32 0.40261996, %v259_v18  ;;  %p695_p7 = pneg %p694_p3 }
  0x41   : > { %v270_v12 = vld [vmem:[#allocation2 + $0xa] sm:$0xff]  ;;  %v256_v14 = vadd.f32 %v254_v9, %v250_v8  ;;  %v266_v15 = vmul.f32 0.24420135, %v264_v11  ;;  %v271_v24 = vld [vmem:[#allocation2 + $0x12] sm:$0xff]  ;;  %v267_v27 = vmul.f32 0.24420135, %v265_v19 }
  0x42   : > { %v249_v13 = vld [vmem:[#allocation2 + $0xe] sm:$0xff]  ;;  %v272_v21 = vmul.f32 0.054488685, %v270_v12  ;;  %v273_v30 = vmul.f32 0.054488685, %v271_v24  ;;  %p700_p13 = pnand %p699_p12, %p695_p7 }
  0x43   : > { %v251_v16 = vmul.f32 0.054488685, %v249_v13  ;;  %v262_v20 = vadd.f32 %v260_v10, %v256_v14 }
  0x45   : > { %v268_v25 = vadd.f32 %v266_v15, %v262_v20  ;;  %v257_v26 = vadd.f32 %v255_v22, %v251_v16 }
  0x47   : > { %v274_v28 = vadd.f32 %v272_v21, %v268_v25  ;;  %v263_v29 = vadd.f32 %v261_v23, %v257_v26 }
  0x49   : > { %503 = vmatmul.msk.f32.vlgmr.msra.gmra.mxu0 %vm239_vm0, %v274_v28  ;;  %v269_v31 = vadd.f32 %v267_v27, %v263_v29 }
  0x4b   : > { %v275_v32 = vadd.f32 %v273_v30, %v269_v31 }
  0x4d   : > { %504 = vmatmul.msk.f32.vlgmr.msra.gmra.mxu1 %vm239_vm0, %v275_v32 }
  0xc6   : > { %v299_v33 = vpop.f32.mrf.mxu0 }
  0xc7   : > { %305 = vst.msk [vmem:[%s231_s11] sm:$0xff] %vm239_vm0, %v299_v33  ;;  %v307_v34 = vsub.f32 %v242_v3, %v299_v33 }
  0xc9   : > { %309 = vst.msk [vmem:[%s989_s30] sm:$0xff] %vm239_vm0, %v307_v34 }
  0xca   : > { %v302_v35 = vpop.f32.mrf.mxu1 }
  0xcb   : > { %306 = vst.msk [vmem:[%s231_s11 + $0x8] sm:$0xff] %vm239_vm0, %v302_v35  ;;  %v308_v36 = vsub.f32 %v972_v4, %v302_v35 }
  0xcc   : > { %703 = shalt.err (!%p700_p13)
}
  0xcd   : > { %s816_s6 = smov 128   ;;  %s817_s7 = smov 8   ;;  %310 = vst.msk [vmem:[%s989_s30 + $0x8] sm:$0xff] %vm239_vm0, %v308_v36 }
  0xce   : > { %523 = dma.vmem_to_hbm [thread:$0]  (%p921_p2), %s332_s20, 256, %s334_s16, %s312_s26, %s816_s6, %s816_s6, %s817_s7  }
  0xcf   : > { %s317_s9 = scalar_lea.sflag [#allocation10], %s955_s1  ;;  %s718_s11 = sshra.s32 %s999_s21, 4  ;;  %s719_s11 = int_to_ptr.hbm [resolvable:$true] %s718_s11 }
  0xd0   : > { %s720_s25 = scalar_lea.hbm %s719_s11, 16  ;;  %s724_s8 = scalar_lea.hbm %s1059_s3, 128 }
  0xd1   : > { %p721_p0 = scmp.ne.s32.totalorder %s719_s11, %s720_s25  ;;  %p725_p8 = scmp.lt.s32.totalorder %s719_s11, %s1059_s3 }
  0xd2   : > { %p726_p9 = scmp.lt.s32.totalorder %s724_s8, %s720_s25 }
  0xd3   : > { %p722_p4 = pnand %p721_p0, %p921_p2 }
  0xd4   : > { %p727_p1 = por %p726_p9, %p725_p8 }
  0xd5   : > { %p723_p6 = pneg %p722_p4 }
  0xd7   : > { %p728_p3 = pnand %p727_p1, %p723_p6 }
  0xd9   : > { %731 = shalt.err (!%p728_p3)
}
  0xda   : > { %524 = dma.vmem_to_hbm [thread:$0]  (%p921_p2), %s995_s15, 256, %s999_s21, %s317_s9, %s816_s6, %s816_s6, %s817_s7  }
  0xdb PF: > { %s1084_s1 = sld [smem:[#allocation15_spill]]  ;;  %p545_p7 = scmp.ge.s32.totalorder %s810_s19, 2 }
  0xdd   : > { %p536_p10 = pnand %p545_p7, %p893_p5 }
  0xdf   : > { %p537_p11 = pneg %p536_p10 }
  0xe1   : > { %s367_s30 = sand.u32 1, %s1084_s1  }
  0xe2   : > { %s368_s16 = scalar_lea.sflag [#allocation5], %s367_s30 }
  0xe3   : > { %773 = dma.done.wait (%p537_p11), %s368_s16, 256  }
  0xe4   : > { %775 = vsyncadd (%p537_p11), %s368_s16, 4294967040  ;;  %s378_s26 = scalar_lea.sflag [#allocation10], %s367_s30 }
  0xe5   : > { %777 = dma.done.wait (%p537_p11), %s378_s26, 256  }
  0xe6   : > { %779 = vsyncadd (%p537_p11), %s378_s26, 4294967040  ;;  %s24_s19 = sadd.s32 1, %s810_s19   ;;  %s1086_s10 = sld [smem:[#allocation17_spill]] }
  0xe7   : > { %p21_p12 = scmp.ge.s32.totalorder %s24_s19, 10   ;;  %s1087_s21 = sld [smem:[#allocation19_spill]] }
  0xe8   : > { %s1088_s12 = smov %s786_s13  ;;  %s1089_s13 = smov %s790_s14 }
  0xe9   : > { %s1090_s14 = smov %s940_s5  ;;  %s1091_s15 = smov %s802_s17 }
  0xea   : > { %s1092_s16 = smov %s806_s18  ;;  %23 = sbr.rel (!%p21_p12) target bundleno = 12 (0xc), region = 94 }
  0xec   : > { %s1093_s17 = smov %s1086_s10 }
  0xed   : > { %s1094_s18 = smov %s1087_s21 }
  0xef   :  { %384 = vsyncpa [#allocation4], 1 }
  0xf0   :  { %386 = vsyncpa [#allocation4 + $0x1], 1 }
  0xf1   :  { %387 = vsyncpa [#allocation7], 1 }
  0xf2   :  { %388 = vsyncpa [#allocation5], 1 }
  0xf3   :  { %390 = vsyncpa [#allocation5 + $0x1], 1 }
  0xf4   :  { %391 = vsyncpa [#allocation10], 1 }
  0xf5   :  { %393 = vsyncpa [#allocation10 + $0x1], 1 }

</bundles_post_ra>
